<compile_context>
chip_gen: v7x
topology: tpu7x:2x2x1
jax: 0.10.0
libtpu: 0.0.40
codegen_flags: <defaults>
</compile_context>

<pallas_src>
from functools import lru_cache, partial

import numpy as np
import jax
import jax.numpy as jnp
from jax.experimental import pallas as pl
from jax.experimental.pallas import tpu as pltpu


def _bilinear_1d_matrix(in_size, out_size):
    """PyTorch F.interpolate(mode='bilinear', align_corners=False) as a matrix."""
    m = np.zeros((out_size, in_size), np.float32)
    scale = in_size / out_size
    for i in range(out_size):
        src = max((i + 0.5) * scale - 0.5, 0.0)
        i0 = min(int(np.floor(src)), in_size - 1)
        i1 = min(i0 + 1, in_size - 1)
        w1 = src - i0
        m[i, i0] += 1.0 - w1
        m[i, i1] += w1
    return m


@lru_cache(maxsize=None)
def _upsample_matrix(S, L):
    """Cached (S*S, L*L) bilinear-resize matrix (transposed for z @ R^T)."""
    m1d = _bilinear_1d_matrix(S, L)                          # (L, S)
    return np.ascontiguousarray(np.kron(m1d, m1d).T)         # (S*S, L*L)


def _multi_tensorcore_chip():
    """Best-effort: does this chip expose >1 TensorCore behind one device?"""
    try:
        kind = jax.devices()[0].device_kind.lower()
    except Exception:
        return False
    # v4 / v7x: 2 TensorCores per chip -> keep a parallel batch grid axis.
    return ("v4" in kind) or ("v7" in kind) or ("7x" in kind)


@partial(jax.jit, static_argnums=(2, 3, 4))
def _conv_up_impl(t_all, params, side_length, use_bf16_operands, batch_grid):
    B, n_tok, C = t_all.shape
    n_patch = n_tok - 1
    S = int(np.sqrt(n_patch))
    assert S * S == n_patch, "token count (minus CLS) must be a perfect square"
    L = int(side_length)
    LL = L * L

    w = params["w"]                    # (Cout, C, 1, 1)
    bias = params["b"]                 # (Cout,)
    gamma = params["gamma"]
    beta = params["beta"]
    rmean = params["running_mean"]
    rvar = params["running_var"]
    eps = params["eps"]
    Cout = w.shape[0]

    # Fold conv bias + inference BatchNorm into weight scale + shift (f32, tiny).
    scale = gamma / jnp.sqrt(rvar + eps)                      # (Cout,)
    w_fold = w.reshape(Cout, C) * scale[:, None]              # (Cout, C)
    shift = ((bias - rmean) * scale + beta).reshape(Cout, 1)  # (Cout, 1)

    op_dtype = jnp.bfloat16 if use_bf16_operands else jnp.float32
    op_bytes = 2 if use_bf16_operands else 4

    # Bilinear upsample matrix: built once per (S, L) (lru_cache) and embedded
    # as a jit constant, not re-uploaded per call.
    r_np = _upsample_matrix(S, L)                             # (S*S, L*L)
    # Double-buffered VMEM guard for the dense Kronecker operand.
    assert 2 * r_np.size * op_bytes < 24 * 1024 * 1024, (
        "upsample matrix too large for VMEM; switch to separable 1-D resizes")
    r_t = jnp.asarray(r_np, dtype=op_dtype)

    # CLS-token drop done once here: kernel blocks stay (8,128)-aligned.
    t = t_all[:, 1:, :].astype(op_dtype)                      # (B, N, C)

    # Single-TC chips: one grid step over the whole batch (Bblk = B).
    # Multi-TC chips (v4/v7x): one batch element per step, parallel axis.
    Bblk = 1 if batch_grid else B
    steps = B // Bblk

    def kernel(t_ref, w_ref, shift_ref, rt_ref, o_ref):
        # t_ref: (Bblk, N, C)   w_ref: (Cout, C)   shift_ref: (Cout, 1)
        # rt_ref: (S*S, L*L)    o_ref: (Bblk, Cout, L*L)
        t_blk = t_ref[...]
        # 1x1 conv with folded BN scale, batched over Bblk:
        # (Bblk, Cout, C) x (Bblk, N, C) -> (Bblk, Cout, N), f32 accumulate.
        w_b = jnp.broadcast_to(w_ref[...].astype(t_blk.dtype), (Bblk, Cout, C))
        z = jax.lax.dot_general(
            w_b, t_blk,
            dimension_numbers=(((2,), (2,)), ((0,), (0,))),
            preferred_element_type=jnp.float32)
        # BN shift + ReLU epilogue kept in f32 (no bf16 VPU math on v5e).
        z = jnp.maximum(z + shift_ref[...], 0.0)
        # Fuse batch into the MXU row dim and do ONE lane-dense upsample matmul:
        # (Bblk*Cout, S*S) @ (S*S, L*L) -> (Bblk*Cout, L*L).
        zz = z.reshape(Bblk * Cout, n_patch).astype(rt_ref.dtype)
        up = jnp.dot(zz, rt_ref[...], preferred_element_type=jnp.float32)
        o_ref[...] = up.reshape(Bblk, Cout, LL).astype(o_ref.dtype)

    flops = 2 * B * (Cout * C * n_patch + Cout * n_patch * LL)
    bytes_accessed = (op_bytes * (B * n_patch * C + n_patch * LL)
                      + 4 * (Cout * C + Cout + B * Cout * LL))

    out_flat = pl.pallas_call(
        kernel,
        out_shape=jax.ShapeDtypeStruct((B, Cout, LL), t_all.dtype),
        grid_spec=pltpu.PrefetchScalarGridSpec(
            num_scalar_prefetch=0,
            grid=(steps,),
            in_specs=[
                pl.BlockSpec((Bblk, n_patch, C), lambda b: (b, 0, 0)),
                pl.BlockSpec((Cout, C), lambda b: (0, 0)),
                pl.BlockSpec((Cout, 1), lambda b: (0, 0)),
                pl.BlockSpec((n_patch, LL), lambda b: (0, 0)),
            ],
            out_specs=pl.BlockSpec((Bblk, Cout, LL), lambda b: (b, 0, 0)),
        ),
        compiler_params=pltpu.CompilerParams(
            dimension_semantics=("parallel",)),
        cost_estimate=pl.CostEstimate(
            flops=flops, transcendentals=0, bytes_accessed=bytes_accessed),
    )(t, w_fold, shift, r_t)

    # Module contract returns NCHW; if the consumer can take the flat
    # (B, Cout, L*L) slab, skip this reshape to keep the lane-dense layout.
    return out_flat.reshape(B, Cout, L, L)


def conv_up_forward(t_all, side_length, params, *,
                    use_bf16_operands=False, batch_grid=None):
    if batch_grid is None:
        batch_grid = _multi_tensorcore_chip() and t_all.shape[0] > 1
    return _conv_up_impl(t_all, params, int(side_length),
                         bool(use_bf16_operands), bool(batch_grid))


def _reference_forward(t_all, side_length, params):
    """Pure-JAX reference implementing the PyTorch math directly."""
    t = t_all[:, 1:, :]
    B, N, C = t.shape
    S = int(np.sqrt(N))
    x = jnp.transpose(t, (0, 2, 1)).reshape(B, C, S, S)
    Cout = params["w"].shape[0]
    w = params["w"].reshape(Cout, C)
    y = jnp.einsum("bchw,oc->bohw", x, w,
                   precision=jax.lax.Precision.HIGHEST)
    y = y + params["b"][None, :, None, None]
    scale = params["gamma"] / jnp.sqrt(params["running_var"] + params["eps"])
    y = (y - params["running_mean"][None, :, None, None]) * scale[None, :, None, None] \
        + params["beta"][None, :, None, None]
    y = jnp.maximum(y, 0.0)

    # PyTorch bilinear resize, align_corners=False.
    def src_idx(in_size, out_size):
        i = np.arange(out_size, dtype=np.float64)
        src = np.maximum((i + 0.5) * (in_size / out_size) - 0.5, 0.0)
        i0 = np.minimum(np.floor(src).astype(np.int64), in_size - 1)
        i1 = np.minimum(i0 + 1, in_size - 1)
        w1 = (src - i0).astype(np.float32)
        return i0, i1, w1

    L = side_length
    y0, y1, wy = src_idx(S, L)
    x0, x1, wx = src_idx(S, L)
    rows = y[:, :, y0, :] * (1.0 - wy)[None, None, :, None] \
        + y[:, :, y1, :] * wy[None, None, :, None]
    out = rows[:, :, :, x0] * (1.0 - wx)[None, None, None, :] \
        + rows[:, :, :, x1] * wx[None, None, None, :]
    return out


if __name__ == "__main__":
    B = 2
    tran_scale_channel = 32    # C (transformer embedding dim)
    conv_scale_channel = 8     # Cout
    S = 8                      # patch-grid side -> N = 64 patch tokens (+1 CLS)
    side_length = 16           # bilinear upsample target

    key = jax.random.PRNGKey(0)
    ks = jax.random.split(key, 7)
    t_all = jax.random.normal(ks[0], (B, S * S + 1, tran_scale_channel), jnp.float32)

    params = {
        "w": 0.1 * jax.random.normal(
            ks[1], (conv_scale_channel, tran_scale_channel, 1, 1), jnp.float32),
        "b": 0.05 * jax.random.normal(ks[2], (conv_scale_channel,), jnp.float32),
        "gamma": 1.0 + 0.1 * jax.random.normal(ks[3], (conv_scale_channel,), jnp.float32),
        "beta": 0.1 * jax.random.normal(ks[4], (conv_scale_channel,), jnp.float32),
        "running_mean": 0.1 * jax.random.normal(ks[5], (conv_scale_channel,), jnp.float32),
        "running_var": jnp.abs(jax.random.normal(ks[6], (conv_scale_channel,), jnp.float32)) + 0.5,
        "eps": 1e-6,
    }

    ref = _reference_forward(t_all, side_length, params)

    # Default path (auto-selects single-step vs per-batch grid for this chip).
    out = jax.block_until_ready(conv_up_forward(t_all, side_length, params))
    assert out.shape == (B, conv_scale_channel, side_length, side_length)
    assert jnp.allclose(out, ref, atol=2e-3, rtol=2e-3), \
        float(jnp.max(jnp.abs(out - ref)))

    # Explicitly exercise both grid strategies (single fused step / per-batch step).
    out_single = jax.block_until_ready(
        conv_up_forward(t_all, side_length, params, batch_grid=False))
    assert jnp.allclose(out_single, ref, atol=2e-3, rtol=2e-3), \
        float(jnp.max(jnp.abs(out_single - ref)))
    out_grid = jax.block_until_ready(
        conv_up_forward(t_all, side_length, params, batch_grid=True))
    assert jnp.allclose(out_grid, ref, atol=2e-3, rtol=2e-3), \
        float(jnp.max(jnp.abs(out_grid - ref)))

    # bf16-operand path (halves the kernel's HBM bytes; f32 accumulate/epilogue).
    out_bf16 = jax.block_until_ready(
        conv_up_forward(t_all, side_length, params, use_bf16_operands=True))
    assert jnp.allclose(out_bf16, ref, atol=6e-2, rtol=6e-2), \
        float(jnp.max(jnp.abs(out_bf16 - ref)))

    print("KERNEL_OK")
</pallas_src>

<mosaic_0001>
module attributes {stable_mosaic.version = 11 : i64} {
  func.func @kernel(%arg0: i32, %arg1: memref<2x64x32xf32, #tpu.memory_space<vmem>>, %arg2: memref<8x32xf32, #tpu.memory_space<vmem>>, %arg3: memref<8x1xf32, #tpu.memory_space<vmem>>, %arg4: memref<64x256xf32, #tpu.memory_space<vmem>>, %arg5: memref<2x8x256xf32, #tpu.memory_space<vmem>>) attributes {dimension_semantics = [#tpu.dimension_semantics<parallel>], iteration_bounds = array<i64: 1>, scalar_prefetch = 0 : i64, scratch_operands = 0 : i64, tpu.core_type = #tpu.core_type<tc>, window_params = [{transform_indices = @transform_0, window_bounds = array<i64: 2, 64, 32>}, {pipeline_mode = #tpu.pipeline_mode<synchronous>, transform_indices = @transform_1, window_bounds = array<i64: 8, 32>}, {pipeline_mode = #tpu.pipeline_mode<synchronous>, transform_indices = @transform_2, window_bounds = array<i64: 8, 1>}, {pipeline_mode = #tpu.pipeline_mode<synchronous>, transform_indices = @transform_3, window_bounds = array<i64: 64, 256>}, {transform_indices = @transform_4, window_bounds = array<i64: 2, 8, 256>}]} {
    %c0 = arith.constant 0 : index
    %c0_0 = arith.constant 0 : index
    %c0_1 = arith.constant 0 : index
    %0 = vector.load %arg1[%c0, %c0_0, %c0_1] : memref<2x64x32xf32, #tpu.memory_space<vmem>>, vector<2x64x32xf32>
    %c0_2 = arith.constant 0 : index
    %c0_3 = arith.constant 0 : index
    %1 = vector.load %arg2[%c0_2, %c0_3] : memref<8x32xf32, #tpu.memory_space<vmem>>, vector<8x32xf32>
    %2 = vector.shape_cast %1 : vector<8x32xf32> to vector<1x8x32xf32>
    %3 = vector.broadcast %2 : vector<1x8x32xf32> to vector<2x8x32xf32>
    %cst = arith.constant dense<0.000000e+00> : vector<2x8x64xf32>
    %4 = tpu.matmul %3, %0, %cst {dimension_numbers = #tpu.dot_dimension_numbers<[2], [2], [1], [1], [0, 0, 0, 1, 1, 1], [0], [0]>} : vector<2x8x32xf32>, vector<2x64x32xf32>, vector<2x8x64xf32> -> vector<2x8x64xf32>
    %c0_4 = arith.constant 0 : index
    %c0_5 = arith.constant 0 : index
    %5 = vector.load %arg3[%c0_4, %c0_5] : memref<8x1xf32, #tpu.memory_space<vmem>>, vector<8x1xf32>
    %6 = vector.shape_cast %5 : vector<8x1xf32> to vector<1x8x1xf32>
    %7 = vector.broadcast %6 : vector<1x8x1xf32> to vector<2x8x64xf32>
    %8 = arith.addf %4, %7 : vector<2x8x64xf32>
    %cst_6 = arith.constant 0.000000e+00 : f32
    %9 = vector.broadcast %cst_6 : f32 to vector<2x8x64xf32>
    %10 = arith.maximumf %8, %9 : vector<2x8x64xf32>
    %11 = vector.shape_cast %10 : vector<2x8x64xf32> to vector<16x64xf32>
    %c0_7 = arith.constant 0 : index
    %c0_8 = arith.constant 0 : index
    %12 = vector.load %arg4[%c0_7, %c0_8] : memref<64x256xf32, #tpu.memory_space<vmem>>, vector<64x256xf32>
    %cst_9 = arith.constant dense<0.000000e+00> : vector<16x256xf32>
    %13 = tpu.matmul %11, %12, %cst_9 {dimension_numbers = #tpu.dot_dimension_numbers<[1], [0], [0], [1], [0, 0, 1, 1], [], []>} : vector<16x64xf32>, vector<64x256xf32>, vector<16x256xf32> -> vector<16x256xf32>
    %14 = vector.shape_cast %13 : vector<16x256xf32> to vector<2x8x256xf32>
    %c0_10 = arith.constant 0 : index
    %c0_11 = arith.constant 0 : index
    %c0_12 = arith.constant 0 : index
    %15 = vector.load %arg5[%c0_10, %c0_11, %c0_12] : memref<2x8x256xf32, #tpu.memory_space<vmem>>, vector<2x8x256xf32>
    tpu.vector_store %arg5[%c0_10, %c0_11, %c0_12], %14 {strides = array<i32>} : memref<2x8x256xf32, #tpu.memory_space<vmem>>, vector<2x8x256xf32>,
    return
  }
  func.func @transform_0(%arg0: i32) -> (i32, i32, i32) {
    %c0_i32 = arith.constant 0 : i32
    %c0_i32_0 = arith.constant 0 : i32
    %c0_i32_1 = arith.constant 0 : i32
    return %arg0, %c0_i32, %c0_i32_0 : i32, i32, i32
  }
  func.func @transform_1(%arg0: i32) -> (i32, i32) {
    %c0_i32 = arith.constant 0 : i32
    %c0_i32_0 = arith.constant 0 : i32
    %c0_i32_1 = arith.constant 0 : i32
    return %c0_i32, %c0_i32_0 : i32, i32
  }
  func.func @transform_2(%arg0: i32) -> (i32, i32) {
    %c0_i32 = arith.constant 0 : i32
    %c0_i32_0 = arith.constant 0 : i32
    %c0_i32_1 = arith.constant 0 : i32
    return %c0_i32, %c0_i32_0 : i32, i32
  }
  func.func @transform_3(%arg0: i32) -> (i32, i32) {
    %c0_i32 = arith.constant 0 : i32
    %c0_i32_0 = arith.constant 0 : i32
    %c0_i32_1 = arith.constant 0 : i32
    return %c0_i32, %c0_i32_0 : i32, i32
  }
  func.func @transform_4(%arg0: i32) -> (i32, i32, i32) {
    %c0_i32 = arith.constant 0 : i32
    %c0_i32_0 = arith.constant 0 : i32
    %c0_i32_1 = arith.constant 0 : i32
    return %arg0, %c0_i32, %c0_i32_0 : i32, i32, i32
  }
}

</mosaic_0001>

<bundles_post_ra>
// kernel: _conv_up_impl.1
= control target key start
LH: loop header
LB: loop body
LE: loop exit
PB: predicated region body
PF: predicated region fallthrough
CT: control target
= control target key end

     0   :  { %vm40_vm0 = vcmask 261120   ;;  %v479_v0 = vmov 0.0|0.0   ;;  %vm480_vm2 = vmmov 0   ;;  %v481_v7 = vmov 0.0   ;;  %s650_s0 = inlined_call_operand.vmem [shape: f32[2,64,32], index: 0, kind: input, shape index: {}]   ;;  %s651_s2 = inlined_call_operand.vmem [shape: f32[8,1], index: 2, kind: input, shape index: {}]   ;;  %s652_s3 = inlined_call_operand.vmem [shape: f32[64,256], index: 3, kind: input, shape index: {}]   ;;  %s653_s1 = inlined_call_operand.vmem [shape: f32[8,32], index: 1, kind: input, shape index: {}]   ;;  %s654_s4 = inlined_call_operand.vmem [shape: f32[2,8,256], index: 4, kind: output, shape index: {}]  }
   0x1   :  { %418 = vmatprep.subr.bf16.mxu0 %v479_v0  ;;  %434 = vmatprep.subr.bf16.mxu1 %v479_v0  ;;  %v17_v1 = vld [vmem:[%s650_s0] sm:$0xff]  ;;  %v18_v2 = vld [vmem:[%s650_s0 + $0x8] sm:$0xff]  ;;  %vm516_vm1 = vmpackc.low %vm40_vm0, %vm40_vm0  ;;  %v482_v9 = vmov 0   ;;  %vm250_vm3 = vcmask 523264  }
   0x2   :  { %v419_v4 = vpack.c.bf16 %v18_v2, %v17_v1  ;;  %v25_v5 = vld [vmem:[%s650_s0 + $0x40] sm:$0xff]  ;;  %v26_v6 = vld [vmem:[%s650_s0 + $0x48] sm:$0xff]  ;;  %396 = vmatprep.mubr.msk.f32.mxu0 %vm480_vm2, %v481_v7  ;;  %415 = vmatprep.mubr.msk.f32.mxu1 %vm480_vm2, %v481_v7  ;;  %v19_v10 = vld [vmem:[%s650_s0 + $0x10] sm:$0xff] }
   0x3   :  { %v435_v8 = vpack.c.bf16 %v26_v6, %v25_v5  ;;  %478 = vset.pattern.permute.xlu0 %v482_v9  ;;  %v20_v11 = vld [vmem:[%s650_s0 + $0x18] sm:$0xff]  ;;  %v27_v12 = vld [vmem:[%s650_s0 + $0x50] sm:$0xff]  ;;  %v34_v14 = vld [vmem:[%s651_s2] sm:$0xff] }
   0x4   :  { %421 = vmatpush3.bf16.xpose.msk.msra.mxu0 %vm516_vm1, %v419_v4  ;;  %v28_v13 = vld [vmem:[%s650_s0 + $0x58] sm:$0xff]  ;;  %v423_v15 = vpack.c.bf16 %v20_v11, %v19_v10  ;;  %37 = vperm.xlu0 %478, %v34_v14   ;;  %v21_v17 = vld [vmem:[%s650_s0 + $0x20] sm:$0xff]  ;;  %v22_v18 = vld [vmem:[%s650_s0 + $0x28] sm:$0xff] }
   0x5   :  { %437 = vmatpush3.bf16.xpose.msk.msra.mxu1 %vm516_vm1, %v435_v8  ;;  %422 = vmatprep.subr.bf16.mxu0 %v479_v0  ;;  %v439_v16 = vpack.c.bf16 %v28_v13, %v27_v12  ;;  %v29_v19 = vld [vmem:[%s650_s0 + $0x60] sm:$0xff]  ;;  %v30_v20 = vld [vmem:[%s650_s0 + $0x68] sm:$0xff]  ;;  %v427_v21 = vpack.c.bf16 %v22_v18, %v21_v17  ;;  %v23_v23 = vld [vmem:[%s650_s0 + $0x30] sm:$0xff] }
   0x6   :  { %438 = vmatprep.subr.bf16.mxu1 %v479_v0  ;;  %v443_v22 = vpack.c.bf16 %v30_v20, %v29_v19  ;;  %v24_v24 = vld [vmem:[%s650_s0 + $0x38] sm:$0xff]  ;;  %v31_v25 = vld [vmem:[%s650_s0 + $0x70] sm:$0xff]  ;;  %v235_v27 = vld [vmem:[%s652_s3 + $0x8] sm:$0xff] }
   0x7   :  { %v32_v26 = vld [vmem:[%s650_s0 + $0x78] sm:$0xff]  ;;  %v431_v29 = vpack.c.bf16 %v24_v24, %v23_v23  ;;  %v234_v32 = vld [vmem:[%s652_s3] sm:$0xff]  ;;  %v236_v33 = vld [vmem:[%s652_s3 + $0x10] sm:$0xff] }
   0x8   :  { %v237_v28 = vld [vmem:[%s652_s3 + $0x18] sm:$0xff]  ;;  %v447_v30 = vpack.c.bf16 %v32_v26, %v31_v25  ;;  %v239_v34 = vld [vmem:[%s652_s3 + $0x28] sm:$0xff]  ;;  %v33_v36 = vld [vmem:[%s653_s1] sm:$0xff]  ;;  %v452_v37 = vpack.c.bf16 %v236_v33, %v234_v32 }
   0x9   :  { %v450_v31 = vpack.c.bf16 %v237_v28, %v235_v27  ;;  %v241_v35 = vld [vmem:[%s652_s3 + $0x38] sm:$0xff]  ;;  %v238_v39 = vld [vmem:[%s652_s3 + $0x20] sm:$0xff]  ;;  %v240_v40 = vld [vmem:[%s652_s3 + $0x30] sm:$0xff] }
   0xa   :  { %v454_v38 = vpack.c.bf16 %v241_v35, %v239_v34  ;;  %v243_v41 = vld [vmem:[%s652_s3 + $0x48] sm:$0xff]  ;;  %v245_v42 = vld [vmem:[%s652_s3 + $0x58] sm:$0xff]  ;;  %v456_v43 = vpack.c.bf16 %v240_v40, %v238_v39  ;;  %v242_v45 = vld [vmem:[%s652_s3 + $0x40] sm:$0xff] }
   0xb   :  { %v458_v44 = vpack.c.bf16 %v245_v42, %v243_v41  ;;  %v244_v46 = vld [vmem:[%s652_s3 + $0x50] sm:$0xff]  ;;  %v247_v48 = vld [vmem:[%s652_s3 + $0x68] sm:$0xff]  ;;  %v249_v49 = vld [vmem:[%s652_s3 + $0x78] sm:$0xff] }
   0xc   :  { %425 = vmatpush3.bf16.xpose.msk.msra.mxu0 %vm516_vm1, %v423_v15  ;;  %v460_v47 = vpack.c.bf16 %v244_v46, %v242_v45  ;;  %v462_v50 = vpack.c.bf16 %v249_v49, %v247_v48  ;;  %v246_v51 = vld [vmem:[%s652_s3 + $0x60] sm:$0xff]  ;;  %v248_v52 = vld [vmem:[%s652_s3 + $0x70] sm:$0xff] }
   0xd   :  { %441 = vmatpush3.bf16.xpose.msk.msra.mxu1 %vm516_vm1, %v439_v16  ;;  %426 = vmatprep.subr.bf16.mxu0 %v479_v0  ;;  %v464_v53 = vpack.c.bf16 %v248_v52, %v246_v51 }
   0xe   :  { %442 = vmatprep.subr.bf16.mxu1 %v479_v0 }
  0x14   :  { %429 = vmatpush3.bf16.xpose.msk.msra.mxu0 %vm516_vm1, %v427_v21 }
  0x15   :  { %445 = vmatpush3.bf16.xpose.msk.msra.mxu1 %vm516_vm1, %v443_v22  ;;  %430 = vmatprep.subr.bf16.mxu0 %v479_v0 }
  0x16   :  { %446 = vmatprep.subr.bf16.mxu1 %v479_v0 }
  0x1c   :  { %433 = vmatpush3.bf16.xpose.msk.msra.mxu0 %vm516_vm1, %v431_v29 }
  0x1d   :  { %449 = vmatpush3.bf16.xpose.msk.msra.mxu1 %vm516_vm1, %v447_v30  ;;  %451 = vmatprep.subr.bf16.mxu0 %v450_v31 }
  0x1e   :  { %466 = vmatprep.subr.bf16.mxu1 %v450_v31 }
  0x23   :  { %397 = vmatmul.mubr.msk.f32.vlgmr.msra.gmra.mrb[0].mxu0 %vm40_vm0, %v33_v36 }
  0x24   :  { %416 = vmatmul.mubr.msk.f32.vlgmr.msra.gmra.mrb[0].mxu1 %vm40_vm0, %v33_v36  ;;  %453 = vmatpush1.bf16.msra.mxu0 %v452_v37 }
  0x25   :  { %470 = vmatpush1.bf16.msra.mxu1 %v452_v37  ;;  %455 = vmatprep.subr.bf16.mxu0 %v454_v38 }
  0x26   :  { %467 = vmatprep.subr.bf16.mxu1 %v454_v38  ;;  %321 = vmatprep.mubr.f32.mxu0 %v481_v7 }
  0x27   :  { %327 = vmatprep.mubr.f32.mxu1 %v481_v7 }
  0x28   :  { %457 = vmatpush1.bf16.msra.mxu0 %v456_v43 }
  0x29   :  { %471 = vmatpush1.bf16.msra.mxu1 %v456_v43  ;;  %459 = vmatprep.subr.bf16.mxu0 %v458_v44 }
  0x2a   :  { %468 = vmatprep.subr.bf16.mxu1 %v458_v44 }
  0x2c   :  { %461 = vmatpush1.bf16.msra.mxu0 %v460_v47 }
  0x2d   :  { %472 = vmatpush1.bf16.msra.mxu1 %v460_v47  ;;  %463 = vmatprep.subr.bf16.mxu0 %v462_v50 }
  0x2e   :  { %469 = vmatprep.subr.bf16.mxu1 %v462_v50 }
  0x30   :  { %465 = vmatpush1.bf16.msra.mxu0 %v464_v53 }
  0x31   :  { %473 = vmatpush1.bf16.msra.mxu1 %v464_v53 }
  0x83   :  { %v38_v54 = vpop.permute.xlu0 %37 }
  0xf6   :  { %v134_v55 = vpop.f32.mrb[0].mxu0 }
  0xf7   :  { %v135_v56 = vadd.f32 %v134_v55, %v38_v54  ;;  %v228_v57 = vpop.f32.mrb[0].mxu1  ;;  %v398_v58 = vpop.f32.mrb[1].mxu0 }
  0xf8   :  { %v229_v59 = vadd.f32 %v228_v57, %v38_v54  ;;  %v417_v60 = vpop.f32.mrb[1].mxu1 }
  0xf9   :  { %v232_v61 = vmax.f32 %v135_v56, 0.0 }
  0xfa   :  { %v233_v62 = vmax.f32 %v229_v59, 0.0 }
  0xfb   :  { %360 = vmatmul.mubr.msk.f32.vlgmr.msra.gmra.mrb[2].mxu0 %vm250_vm3, %v232_v61 }
  0xfc   :  { %361 = vmatmul.mubr.msk.f32.vlgmr.msra.gmra.mrb[2].mxu1 %vm250_vm3, %v233_v62 }
 0x1ce   :  { %v323_v63 = vpop.f32.mrb[2].mxu0 }
 0x1cf   :  { %334 = vst [vmem:[%s654_s4] sm:$0xff] %v323_v63  ;;  %v329_v0 = vpop.f32.mrb[2].mxu1  ;;  %v325_v1 = vpop.f32.mrb[3].mxu0 }
 0x1d0   :  { %336 = vst [vmem:[%s654_s4 + $0x10] sm:$0xff] %v329_v0  ;;  %335 = vst [vmem:[%s654_s4 + $0x8] sm:$0xff] %v325_v1  ;;  %v331_v2 = vpop.f32.mrb[3].mxu1 }
 0x1d1   :  { %337 = vst [vmem:[%s654_s4 + $0x18] sm:$0xff] %v331_v2 }

</bundles_post_ra>
